<compile_context>
chip_gen: v6e
topology: v6e:2x2x1
jax: 0.10.0
libtpu: 0.0.40
codegen_flags: <defaults>
</compile_context>

<pallas_src>
import jax
import jax.numpy as jnp
from jax.experimental import pallas as pl
from jax.experimental.pallas import tpu as pltpu

LANE = 128
NEG_INF = -1e30


def _round_up(x, m):
    return ((x + m - 1) // m) * m


def mlp_kernel(x_ref,
               w1_ref, b1_ref,
               w2_ref, b2_ref,
               w3_ref, b3_ref,
               w4_ref, b4_ref,
               o_ref):
    # x arrives as f32 straight from HBM; cast to bf16 in-kernel (VPU) so the
    # wrapper never makes a separate pad/cast pass over the dominant stream.
    x = x_ref[...].astype(jnp.bfloat16)

    # Layer 1: (TB,784)bf16 @ (784,128)bf16 -> f32 accumulate, + bias, ReLU.
    h = jnp.dot(x, w1_ref[...],
                preferred_element_type=jnp.float32) + b1_ref[...]
    h = jnp.maximum(h, 0.0).astype(jnp.bfloat16)

    # Layer 2.
    h = jnp.dot(h, w2_ref[...],
                preferred_element_type=jnp.float32) + b2_ref[...]
    h = jnp.maximum(h, 0.0).astype(jnp.bfloat16)

    # Layer 3.
    h = jnp.dot(h, w3_ref[...],
                preferred_element_type=jnp.float32) + b3_ref[...]
    h = jnp.maximum(h, 0.0).astype(jnp.bfloat16)

    # Output layer (pad lanes get logit = -1e30 via b4 padding; logits stay f32).
    logits = jnp.dot(h, w4_ref[...],
                     preferred_element_type=jnp.float32) + b4_ref[...]

    # Numerically stable softmax over 128 lanes (pad lanes -> exp(.) == 0).
    m = jnp.max(logits, axis=-1, keepdims=True)
    e = jnp.exp(logits - m)
    denom = jnp.sum(e, axis=-1, keepdims=True)
    o_ref[...] = (e * pl.reciprocal(denom, approx=True)).astype(o_ref.dtype)


def _choose_batch_tile(B, tb):
    """Pick (TB, Bp) so padding over x is avoided whenever possible."""
    if B <= tb:
        # Single block whose batch dim equals the full array dim -> no (8,128)
        # divisibility constraint, no padding needed (handles B=2).
        return B, B
    tb8 = tb - (tb % 8)
    # Look for a multiple-of-8 tile that divides B exactly (no padding copy).
    for cand in range(tb8, 7, -8):
        if B % cand == 0:
            return cand, B
    # Fall back: pad the batch (extra HBM pass; only for awkward B > tb).
    return tb8, _round_up(B, tb8)


def mlp_forward(x, params, *, tb=2048):
    """x: (B, 784) float32. params: w1..w4 (in,out), b1..b4 (1,out) float32.

    Returns softmax probabilities of shape (B, 10) in float32.
    """
    B, D = x.shape
    n_out = params["w4"].shape[1]

    # --- Lane-dense padding of the feature dims to 128 (tiny, wrapper-side). ---
    def pad2(a, rows, cols, cval=0.0):
        return jnp.pad(a, ((0, rows - a.shape[0]), (0, cols - a.shape[1])),
                       constant_values=cval)

    w1 = pad2(params["w1"], D, LANE).astype(jnp.bfloat16)        # (784,128)
    b1 = pad2(params["b1"], 1, LANE)                             # (1,128) f32
    w2 = pad2(params["w2"], LANE, LANE).astype(jnp.bfloat16)     # (128,128)
    b2 = pad2(params["b2"], 1, LANE)
    w3 = pad2(params["w3"], LANE, LANE).astype(jnp.bfloat16)
    b3 = pad2(params["b3"], 1, LANE)
    w4 = pad2(params["w4"], LANE, LANE).astype(jnp.bfloat16)
    # Pad lanes of the output bias forced to a huge negative so the 128-lane
    # softmax equals the real 10-lane softmax (logits stay f32 in-kernel).
    b4 = pad2(params["b4"], 1, LANE, cval=NEG_INF)

    # --- Batch tiling: avoid re-materializing x unless strictly necessary. ---
    TB, Bp = _choose_batch_tile(B, tb)
    xp = x if Bp == B else jnp.pad(x, ((0, Bp - B), (0, 0)))     # stays f32

    grid = (Bp // TB,)

    x_spec = pl.BlockSpec((TB, D), lambda i: (i, 0))
    # Weights / biases: constant index_map -> DMA'd once, VMEM-resident.
    w_spec = lambda a: pl.BlockSpec(a.shape, lambda i: (0, 0))
    out_spec = pl.BlockSpec((TB, LANE), lambda i: (i, 0))

    out = pl.pallas_call(
        mlp_kernel,
        out_shape=jax.ShapeDtypeStruct((Bp, LANE), jnp.bfloat16),
        grid=grid,
        in_specs=[x_spec,
                  w_spec(w1), w_spec(b1),
                  w_spec(w2), w_spec(b2),
                  w_spec(w3), w_spec(b3),
                  w_spec(w4), w_spec(b4)],
        out_specs=out_spec,
        compiler_params=pltpu.CompilerParams(
            dimension_semantics=("parallel",),
            vmem_limit_bytes=48 * 1024 * 1024,
        ),
    )(xp, w1, b1, w2, b2, w3, b3, w4, b4)

    return out[:B, :n_out].astype(jnp.float32)


def init_params(key, input_shape=(28, 28)):
    """Deterministic init mimicking torch.nn.Linear (uniform +/- 1/sqrt(fan_in))."""
    d_in = input_shape[0] * input_shape[1]
    dims = [d_in, 120, 72, 48, 10]
    params = {}
    keys = jax.random.split(key, 2 * (len(dims) - 1))
    for i in range(len(dims) - 1):
        fan_in, fan_out = dims[i], dims[i + 1]
        bound = 1.0 / (fan_in ** 0.5)
        params[f"w{i+1}"] = jax.random.uniform(
            keys[2 * i], (fan_in, fan_out), jnp.float32, -bound, bound)
        params[f"b{i+1}"] = jax.random.uniform(
            keys[2 * i + 1], (1, fan_out), jnp.float32, -bound, bound)
    return params


if __name__ == "__main__":
    key = jax.random.PRNGKey(0)
    pkey, xkey = jax.random.split(key)

    input_shape = (28, 28)
    batch = 2
    params = init_params(pkey, input_shape)
    x = jax.random.normal(xkey, (batch, input_shape[0] * input_shape[1]),
                          jnp.float32)

    out = mlp_forward(x, params)
    out = jax.block_until_ready(out)

    # Pure-JAX f32 reference of the intended forward.
    def ref(x, p):
        h = jnp.maximum(x @ p["w1"] + p["b1"], 0.0)
        h = jnp.maximum(h @ p["w2"] + p["b2"], 0.0)
        h = jnp.maximum(h @ p["w3"] + p["b3"], 0.0)
        return jax.nn.softmax(h @ p["w4"] + p["b4"], axis=-1)

    expected = ref(x, params)
    assert out.shape == (batch, 10)
    # Tolerances relaxed for bf16 matmul inputs/output and approx EUP reciprocal.
    assert jnp.allclose(jnp.sum(out, axis=-1), 1.0, atol=1e-2)
    assert jnp.allclose(out, expected, atol=2e-2, rtol=2e-2)

    print("KERNEL_OK")
</pallas_src>

<mosaic_0001>
module attributes {stable_mosaic.version = 11 : i64} {
  func.func @mlp_kernel(%arg0: i32, %arg1: memref<2x784xf32, #tpu.memory_space<vmem>>, %arg2: memref<784x128xbf16, #tpu.memory_space<vmem>>, %arg3: memref<1x128xf32, #tpu.memory_space<vmem>>, %arg4: memref<128x128xbf16, #tpu.memory_space<vmem>>, %arg5: memref<1x128xf32, #tpu.memory_space<vmem>>, %arg6: memref<128x128xbf16, #tpu.memory_space<vmem>>, %arg7: memref<1x128xf32, #tpu.memory_space<vmem>>, %arg8: memref<128x128xbf16, #tpu.memory_space<vmem>>, %arg9: memref<1x128xf32, #tpu.memory_space<vmem>>, %arg10: memref<2x128xbf16, #tpu.memory_space<vmem>>) attributes {dimension_semantics = [#tpu.dimension_semantics<parallel>], iteration_bounds = array<i64: 1>, scalar_prefetch = 0 : i64, scratch_operands = 0 : i64, tpu.core_type = #tpu.core_type<tc>, window_params = [{transform_indices = @transform_0, window_bounds = array<i64: 2, 784>}, {pipeline_mode = #tpu.pipeline_mode<synchronous>, transform_indices = @transform_1, window_bounds = array<i64: 784, 128>}, {pipeline_mode = #tpu.pipeline_mode<synchronous>, transform_indices = @transform_2, window_bounds = array<i64: 1, 128>}, {pipeline_mode = #tpu.pipeline_mode<synchronous>, transform_indices = @transform_3, window_bounds = array<i64: 128, 128>}, {pipeline_mode = #tpu.pipeline_mode<synchronous>, transform_indices = @transform_4, window_bounds = array<i64: 1, 128>}, {pipeline_mode = #tpu.pipeline_mode<synchronous>, transform_indices = @transform_5, window_bounds = array<i64: 128, 128>}, {pipeline_mode = #tpu.pipeline_mode<synchronous>, transform_indices = @transform_6, window_bounds = array<i64: 1, 128>}, {pipeline_mode = #tpu.pipeline_mode<synchronous>, transform_indices = @transform_7, window_bounds = array<i64: 128, 128>}, {pipeline_mode = #tpu.pipeline_mode<synchronous>, transform_indices = @transform_8, window_bounds = array<i64: 1, 128>}, {transform_indices = @transform_9, window_bounds = array<i64: 2, 128>}]} {
    %c0 = arith.constant 0 : index
    %c0_0 = arith.constant 0 : index
    %0 = vector.load %arg1[%c0, %c0_0] : memref<2x784xf32, #tpu.memory_space<vmem>>, vector<2x784xf32>
    %1 = arith.truncf %0 : vector<2x784xf32> to vector<2x784xbf16>
    %c0_1 = arith.constant 0 : index
    %c0_2 = arith.constant 0 : index
    %2 = vector.load %arg2[%c0_1, %c0_2] : memref<784x128xbf16, #tpu.memory_space<vmem>>, vector<784x128xbf16>
    %cst = arith.constant dense<0.000000e+00> : vector<2x128xf32>
    %3 = tpu.matmul %1, %2, %cst {dimension_numbers = #tpu.dot_dimension_numbers<[1], [0], [0], [1], [0, 0, 1, 1], [], []>} : vector<2x784xbf16>, vector<784x128xbf16>, vector<2x128xf32> -> vector<2x128xf32>
    %c0_3 = arith.constant 0 : index
    %c0_4 = arith.constant 0 : index
    %4 = vector.load %arg3[%c0_3, %c0_4] : memref<1x128xf32, #tpu.memory_space<vmem>>, vector<1x128xf32>
    %5 = vector.broadcast %4 : vector<1x128xf32> to vector<2x128xf32>
    %6 = arith.addf %3, %5 : vector<2x128xf32>
    %cst_5 = arith.constant 0.000000e+00 : f32
    %7 = vector.broadcast %cst_5 : f32 to vector<2x128xf32>
    %8 = arith.maximumf %6, %7 : vector<2x128xf32>
    %9 = arith.truncf %8 : vector<2x128xf32> to vector<2x128xbf16>
    %c0_6 = arith.constant 0 : index
    %c0_7 = arith.constant 0 : index
    %10 = vector.load %arg4[%c0_6, %c0_7] : memref<128x128xbf16, #tpu.memory_space<vmem>>, vector<128x128xbf16>
    %cst_8 = arith.constant dense<0.000000e+00> : vector<2x128xf32>
    %11 = tpu.matmul %9, %10, %cst_8 {dimension_numbers = #tpu.dot_dimension_numbers<[1], [0], [0], [1], [0, 0, 1, 1], [], []>} : vector<2x128xbf16>, vector<128x128xbf16>, vector<2x128xf32> -> vector<2x128xf32>
    %c0_9 = arith.constant 0 : index
    %c0_10 = arith.constant 0 : index
    %12 = vector.load %arg5[%c0_9, %c0_10] : memref<1x128xf32, #tpu.memory_space<vmem>>, vector<1x128xf32>
    %13 = vector.broadcast %12 : vector<1x128xf32> to vector<2x128xf32>
    %14 = arith.addf %11, %13 : vector<2x128xf32>
    %cst_11 = arith.constant 0.000000e+00 : f32
    %15 = vector.broadcast %cst_11 : f32 to vector<2x128xf32>
    %16 = arith.maximumf %14, %15 : vector<2x128xf32>
    %17 = arith.truncf %16 : vector<2x128xf32> to vector<2x128xbf16>
    %c0_12 = arith.constant 0 : index
    %c0_13 = arith.constant 0 : index
    %18 = vector.load %arg6[%c0_12, %c0_13] : memref<128x128xbf16, #tpu.memory_space<vmem>>, vector<128x128xbf16>
    %cst_14 = arith.constant dense<0.000000e+00> : vector<2x128xf32>
    %19 = tpu.matmul %17, %18, %cst_14 {dimension_numbers = #tpu.dot_dimension_numbers<[1], [0], [0], [1], [0, 0, 1, 1], [], []>} : vector<2x128xbf16>, vector<128x128xbf16>, vector<2x128xf32> -> vector<2x128xf32>
    %c0_15 = arith.constant 0 : index
    %c0_16 = arith.constant 0 : index
    %20 = vector.load %arg7[%c0_15, %c0_16] : memref<1x128xf32, #tpu.memory_space<vmem>>, vector<1x128xf32>
    %21 = vector.broadcast %20 : vector<1x128xf32> to vector<2x128xf32>
    %22 = arith.addf %19, %21 : vector<2x128xf32>
    %cst_17 = arith.constant 0.000000e+00 : f32
    %23 = vector.broadcast %cst_17 : f32 to vector<2x128xf32>
    %24 = arith.maximumf %22, %23 : vector<2x128xf32>
    %25 = arith.truncf %24 : vector<2x128xf32> to vector<2x128xbf16>
    %c0_18 = arith.constant 0 : index
    %c0_19 = arith.constant 0 : index
    %26 = vector.load %arg8[%c0_18, %c0_19] : memref<128x128xbf16, #tpu.memory_space<vmem>>, vector<128x128xbf16>
    %cst_20 = arith.constant dense<0.000000e+00> : vector<2x128xf32>
    %27 = tpu.matmul %25, %26, %cst_20 {dimension_numbers = #tpu.dot_dimension_numbers<[1], [0], [0], [1], [0, 0, 1, 1], [], []>} : vector<2x128xbf16>, vector<128x128xbf16>, vector<2x128xf32> -> vector<2x128xf32>
    %c0_21 = arith.constant 0 : index
    %c0_22 = arith.constant 0 : index
    %28 = vector.load %arg9[%c0_21, %c0_22] : memref<1x128xf32, #tpu.memory_space<vmem>>, vector<1x128xf32>
    %29 = vector.broadcast %28 : vector<1x128xf32> to vector<2x128xf32>
    %30 = arith.addf %27, %29 : vector<2x128xf32>
    %cst_23 = arith.constant dense<0xFF800000> : vector<2xf32>
    %31 = vector.multi_reduction <maximumf>, %30, %cst_23 [1] : vector<2x128xf32> to vector<2xf32>
    %32 = vector.shape_cast %31 : vector<2xf32> to vector<2x1xf32>
    %33 = vector.broadcast %32 : vector<2x1xf32> to vector<2x128xf32>
    %34 = arith.subf %30, %33 : vector<2x128xf32>
    %35 = math.exp %34 : vector<2x128xf32>
    %cst_24 = arith.constant dense<0.000000e+00> : vector<2xf32>
    %36 = vector.multi_reduction <add>, %35, %cst_24 [1] : vector<2x128xf32> to vector<2xf32>
    %37 = vector.shape_cast %36 : vector<2xf32> to vector<2x1xf32>
    %38 = tpu.reciprocal %37 {approx = true} : vector<2x1xf32> -> vector<2x1xf32>
    %39 = vector.broadcast %38 : vector<2x1xf32> to vector<2x128xf32>
    %40 = arith.mulf %35, %39 : vector<2x128xf32>
    %41 = arith.truncf %40 : vector<2x128xf32> to vector<2x128xbf16>
    %c0_25 = arith.constant 0 : index
    %c0_26 = arith.constant 0 : index
    %42 = vector.load %arg10[%c0_25, %c0_26] : memref<2x128xbf16, #tpu.memory_space<vmem>>, vector<2x128xbf16>
    tpu.vector_store %arg10[%c0_25, %c0_26], %41 {strides = array<i32>} : memref<2x128xbf16, #tpu.memory_space<vmem>>, vector<2x128xbf16>,
    return
  }
  func.func @transform_0(%arg0: i32) -> (i32, i32) {
    %c0_i32 = arith.constant 0 : i32
    %c0_i32_0 = arith.constant 0 : i32
    return %arg0, %c0_i32 : i32, i32
  }
  func.func @transform_1(%arg0: i32) -> (i32, i32) {
    %c0_i32 = arith.constant 0 : i32
    %c0_i32_0 = arith.constant 0 : i32
    %c0_i32_1 = arith.constant 0 : i32
    return %c0_i32, %c0_i32_0 : i32, i32
  }
  func.func @transform_2(%arg0: i32) -> (i32, i32) {
    %c0_i32 = arith.constant 0 : i32
    %c0_i32_0 = arith.constant 0 : i32
    %c0_i32_1 = arith.constant 0 : i32
    return %c0_i32, %c0_i32_0 : i32, i32
  }
  func.func @transform_3(%arg0: i32) -> (i32, i32) {
    %c0_i32 = arith.constant 0 : i32
    %c0_i32_0 = arith.constant 0 : i32
    %c0_i32_1 = arith.constant 0 : i32
    return %c0_i32, %c0_i32_0 : i32, i32
  }
  func.func @transform_4(%arg0: i32) -> (i32, i32) {
    %c0_i32 = arith.constant 0 : i32
    %c0_i32_0 = arith.constant 0 : i32
    %c0_i32_1 = arith.constant 0 : i32
    return %c0_i32, %c0_i32_0 : i32, i32
  }
  func.func @transform_5(%arg0: i32) -> (i32, i32) {
    %c0_i32 = arith.constant 0 : i32
    %c0_i32_0 = arith.constant 0 : i32
    %c0_i32_1 = arith.constant 0 : i32
    return %c0_i32, %c0_i32_0 : i32, i32
  }
  func.func @transform_6(%arg0: i32) -> (i32, i32) {
    %c0_i32 = arith.constant 0 : i32
    %c0_i32_0 = arith.constant 0 : i32
    %c0_i32_1 = arith.constant 0 : i32
    return %c0_i32, %c0_i32_0 : i32, i32
  }
  func.func @transform_7(%arg0: i32) -> (i32, i32) {
    %c0_i32 = arith.constant 0 : i32
    %c0_i32_0 = arith.constant 0 : i32
    %c0_i32_1 = arith.constant 0 : i32
    return %c0_i32, %c0_i32_0 : i32, i32
  }
  func.func @transform_8(%arg0: i32) -> (i32, i32) {
    %c0_i32 = arith.constant 0 : i32
    %c0_i32_0 = arith.constant 0 : i32
    %c0_i32_1 = arith.constant 0 : i32
    return %c0_i32, %c0_i32_0 : i32, i32
  }
  func.func @transform_9(%arg0: i32) -> (i32, i32) {
    %c0_i32 = arith.constant 0 : i32
    %c0_i32_0 = arith.constant 0 : i32
    return %arg0, %c0_i32 : i32, i32
  }
}

</mosaic_0001>

<bundles_post_ra>
// kernel: tpu_custom_call.1
= control target key start
LH: loop header
LB: loop body
LE: loop exit
PB: predicated region body
PF: predicated region fallthrough
CT: control target
= control target key end

     0   :  { %14 = vsyncpa [#allocation3], 0  ;;  %s1678_s0 = inlined_call_operand.hbm [shape: f32[2,784], index: 0, kind: input, shape index: {}]   ;;  %s1679_s1 = inlined_call_operand.hbm [shape: bf16[784,128], index: 1, kind: input, shape index: {}]   ;;  %s1680_s2 = inlined_call_operand.vmem [shape: f32[1,128], index: 2, kind: input, shape index: {}]   ;;  %s1681_s3 = inlined_call_operand.hbm [shape: bf16[128,128], index: 3, kind: input, shape index: {}]   ;;  %s1682_s4 = inlined_call_operand.vmem [shape: f32[1,128], index: 4, kind: input, shape index: {}]   ;;  %s1683_s5 = inlined_call_operand.hbm [shape: bf16[128,128], index: 5, kind: input, shape index: {}]   ;;  %s1684_s6 = inlined_call_operand.vmem [shape: f32[1,128], index: 6, kind: input, shape index: {}]   ;;  %s1685_s7 = inlined_call_operand.hbm [shape: bf16[128,128], index: 7, kind: input, shape index: {}]   ;;  %s1686_s8 = inlined_call_operand.vmem [shape: f32[1,128], index: 8, kind: input, shape index: {}]   ;;  %s1687_s9 = inlined_call_operand.hbm [shape: bf16[2,128], index: 9, kind: output, shape index: {}]  }
   0x1   :  { %15 = vsyncpa [#allocation6], 0 }
   0x2   :  { %16 = vsyncpa [#allocation9], 0 }
   0x3   :  { %17 = vsyncpa [#allocation4], 0  ;;  %s1541_s30 = smov [#allocation5]  }
   0x4   :  { %s33_s10 = sshll.u32 %s1541_s30, 4  ;;  %s34_s10 = int_to_ptr.vmem [resolvable:$true] %s33_s10 }
   0x5   :  { %s1421_s11 = scalar_lea.vmem %s34_s10, 6272  ;;  %p1426_p1 = scmp.lt.s32.totalorder %s34_s10, %s34_s10 }
   0x6   :  { %p1422_p0 = scmp.ne.s32.totalorder %s34_s10, %s1421_s11  ;;  %p1427_p2 = scmp.lt.s32.totalorder %s1421_s11, %s1421_s11 }
   0x8   :  { %p1428_p3 = por %p1427_p2, %p1426_p1 }
   0xa   :  { %p1429_p4 = pnand %p1428_p3, %p1422_p0 }
   0xc   :  { %1432 = shalt.err (!%p1429_p4)
}
   0xd   :  { %s1542_s12 = smov 64   ;;  %s1543_s13 = smov 4  }
   0xe   :  { %39 = dma.hbm_to_vmem [thread:$0]  %s1679_s1, 6272, %s34_s10, [#allocation6], %s1542_s12, %s1542_s12, %s1543_s13  }
   0xf   :  { %s1544_s16 = smov [#allocation8]   ;;  %s1545_s18 = smov [#allocation2]  }
  0x10   :  { %s61_s17 = sshll.u32 %s1544_s16, 4  ;;  %s24_s19 = sshll.u32 %s1545_s18, 4  ;;  %s62_s17 = int_to_ptr.vmem [resolvable:$true] %s61_s17  ;;  %s25_s19 = int_to_ptr.vmem [resolvable:$true] %s24_s19 }
  0x11   :  { %s1441_s20 = scalar_lea.vmem %s62_s17, 1024  ;;  %p1446_p6 = scmp.lt.s32.totalorder %s62_s17, %s62_s17 }
  0x12   :  { %p1442_p5 = scmp.ne.s32.totalorder %s62_s17, %s1441_s20  ;;  %p1447_p7 = scmp.lt.s32.totalorder %s1441_s20, %s1441_s20 }
  0x14   :  { %p1448_p8 = por %p1447_p7, %p1446_p6 }
  0x16   :  { %p1449_p9 = pnand %p1448_p8, %p1442_p5 }
  0x18   :  { %1452 = shalt.err (!%p1449_p9)
}
  0x19   :  { %67 = dma.hbm_to_vmem [thread:$0]  %s1683_s5, 1024, %s62_s17, [#allocation9], %s1542_s12, %s1542_s12, %s1543_s13  }
  0x1a   :  { %s1461_s1 = scalar_lea.vmem %s25_s19, 224  ;;  %p1466_p11 = scmp.lt.s32.totalorder %s25_s19, %s25_s19 }
  0x1b   :  { %p1462_p10 = scmp.ne.s32.totalorder %s25_s19, %s1461_s1  ;;  %p1467_p12 = scmp.lt.s32.totalorder %s1461_s1, %s1461_s1 }
  0x1d   :  { %p1468_p13 = por %p1467_p12, %p1466_p11 }
  0x1f   :  { %p1469_p0 = pnand %p1468_p13, %p1462_p10 }
  0x21   :  { %1472 = shalt.err (!%p1469_p0)
}
  0x22   :  { %27 = dma.hbm_to_vmem [thread:$0]  %s1678_s0, 224, %s25_s19, [#allocation3]  }
  0x23   :  { %s1546_s25 = smov [#allocation7]   ;;  %s1547_s27 = smov [#allocation10]  }
  0x24   :  { %s47_s26 = sshll.u32 %s1546_s25, 4  ;;  %s75_s28 = sshll.u32 %s1547_s27, 4  ;;  %s48_s26 = int_to_ptr.vmem [resolvable:$true] %s47_s26  ;;  %s76_s28 = int_to_ptr.vmem [resolvable:$true] %s75_s28 }
  0x25   :  { %s1481_s29 = scalar_lea.vmem %s48_s26, 1024  ;;  %p1486_p2 = scmp.lt.s32.totalorder %s48_s26, %s48_s26 }
  0x26   :  { %p1482_p1 = scmp.ne.s32.totalorder %s48_s26, %s1481_s29  ;;  %p1487_p3 = scmp.lt.s32.totalorder %s1481_s29, %s1481_s29 }
  0x28   :  { %p1488_p4 = por %p1487_p3, %p1486_p2 }
  0x2a   :  { %p1489_p5 = pnand %p1488_p4, %p1482_p1 }
  0x2c   :  { %1492 = shalt.err (!%p1489_p5)
}
  0x2d   :  { %53 = dma.hbm_to_vmem [thread:$0]  %s1681_s3, 1024, %s48_s26, [#allocation6], %s1542_s12, %s1542_s12, %s1543_s13  }
  0x2e   :  { %s1501_s0 = scalar_lea.vmem %s76_s28, 1024  ;;  %p1506_p7 = scmp.lt.s32.totalorder %s76_s28, %s76_s28 }
  0x2f   :  { %p1502_p6 = scmp.ne.s32.totalorder %s76_s28, %s1501_s0  ;;  %p1507_p8 = scmp.lt.s32.totalorder %s1501_s0, %s1501_s0 }
  0x31   :  { %p1508_p9 = por %p1507_p8, %p1506_p7 }
  0x33   :  { %p1509_p10 = pnand %p1508_p9, %p1502_p6 }
  0x35   :  { %1512 = shalt.err (!%p1509_p10)
}
  0x36   :  { %81 = dma.hbm_to_vmem [thread:$0]  %s1685_s7, 1024, %s76_s28, [#allocation9], %s1542_s12, %s1542_s12, %s1543_s13  }
  0x37   :  { %1533 = dma.done.wait [#allocation3], 224  }
  0x38   :  { %1534 = vsyncadd [#allocation3], 4294967072 }
  0x39   :  { %1535 = dma.done.wait [#allocation6], 7296  }
  0x3a   :  { %1536 = vsyncadd [#allocation6], 4294960000 }
  0x3b   :  { %1537 = dma.done.wait [#allocation9], 2048  }
  0x3c   :  { %1538 = vsyncadd [#allocation9], 4294965248  ;;  %v1334_v0 = vld [vmem:[#allocation5 + $0x78] sm:$0xff]   ;;  %v1338_v4 = vld [vmem:[#allocation5 + $0x70] sm:$0xff]   ;;  %v1548_v21 = vmov 1983009808   ;;  %v108_v23 = vlaneseq }
  0x3d   :  { %v1335_v1 = vld [vmem:[#allocation5 + $0x38] sm:$0xff]   ;;  %1162 = vmatprep.subr.bf16.mxu0 %v1334_v0  ;;  %v1339_v5 = vld [vmem:[#allocation5 + $0x30] sm:$0xff]   ;;  %v1342_v8 = vld [vmem:[#allocation5 + $0x68] sm:$0xff]   ;;  %v106_v22 = vunpack.c.l.s4 %v1548_v21  ;;  %v1549_v45 = vmov 0.0   ;;  %vm1550_vm0 = vmmov 0   ;;  %vm550_vm1 = vcmask 130048  }
  0x3e   :  { %v1336_v2 = vld [vmem:[#allocation5 + $0xf8] sm:$0xff]   ;;  %1163 = vmatpush3.bf16.msra.mxu0 %v1335_v1  ;;  %v1340_v6 = vld [vmem:[#allocation5 + $0xf0] sm:$0xff]   ;;  %v1343_v9 = vld [vmem:[#allocation5 + $0x28] sm:$0xff]   ;;  %v109_v29 = vshrl.u32 %v108_v23, 7  ;;  %vm1053_vm2 = vcmask 1041408  }
  0x3f   :  { %v1337_v3 = vld [vmem:[#allocation5 + $0xb8] sm:$0xff]   ;;  %1184 = vmatprep.subr.bf16.mxu1 %v1336_v2  ;;  %1164 = vmatprep.subr.bf16.mxu0 %v1338_v4  ;;  %v1341_v7 = vld [vmem:[#allocation5 + $0xb0] sm:$0xff]   ;;  %v1344_v10 = vld [vmem:[#allocation5 + $0xe8] sm:$0xff]   ;;  %v107_v28 = vunpack.c.0.s8 %v106_v22 }
  0x40   :  { %1185 = vmatpush3.bf16.msra.mxu1 %v1337_v3  ;;  %v1345_v11 = vld [vmem:[#allocation5 + $0xa8] sm:$0xff]   ;;  %v1346_v12 = vld [vmem:[#allocation5 + $0x60] sm:$0xff]   ;;  %v1350_v16 = vld [vmem:[#allocation5 + $0x58] sm:$0xff]  }
  0x41   :  { %1186 = vmatprep.subr.bf16.mxu1 %v1340_v6  ;;  %v1347_v13 = vld [vmem:[#allocation5 + $0x20] sm:$0xff]   ;;  %v1351_v17 = vld [vmem:[#allocation5 + $0x18] sm:$0xff]   ;;  %v1354_v20 = vld [vmem:[#allocation5 + $0x50] sm:$0xff]   ;;  %v110_v34 = vsub.s32 %v107_v28, %v109_v29 }
  0x42   :  { %1165 = vmatpush3.bf16.msra.mxu0 %v1339_v5  ;;  %v1348_v14 = vld [vmem:[#allocation5 + $0xe0] sm:$0xff]   ;;  %v1352_v18 = vld [vmem:[#allocation5 + $0xd8] sm:$0xff]   ;;  %v1355_v24 = vld [vmem:[#allocation5 + $0x10] sm:$0xff]  }
  0x43   :  { %1166 = vmatprep.subr.bf16.mxu0 %v1342_v8  ;;  %v1349_v15 = vld [vmem:[#allocation5 + $0xa0] sm:$0xff]   ;;  %v1353_v19 = vld [vmem:[#allocation5 + $0x98] sm:$0xff]   ;;  %v1356_v25 = vld [vmem:[#allocation5 + $0xd0] sm:$0xff]  }
  0x44   :  { %1187 = vmatpush3.bf16.msra.mxu1 %v1341_v7  ;;  %v1357_v26 = vld [vmem:[#allocation5 + $0x90] sm:$0xff]   ;;  %v1358_v27 = vld [vmem:[#allocation5 + $0x48] sm:$0xff]   ;;  %v1362_v33 = vld [vmem:[#allocation5 + $0x40] sm:$0xff]  }
  0x45   :  { %1188 = vmatprep.subr.bf16.mxu1 %v1344_v10  ;;  %v1359_v30 = vld [vmem:[#allocation5 + $0x8] sm:$0xff]   ;;  %v1363_v35 = vld [vmem:[#allocation5] sm:$0xff]   ;;  %v100_v37 = vld [vmem:[#allocation2] sm:$0xff] }
  0x46   :  { %1167 = vmatpush3.bf16.msra.mxu0 %v1343_v9  ;;  %v1360_v31 = vld [vmem:[#allocation5 + $0xc8] sm:$0xff]   ;;  %v1364_v36 = vld [vmem:[#allocation5 + $0xc0] sm:$0xff]   ;;  %v111_v38 = vrot.slane %v100_v37, %v110_v34  ;;  %v104_v40 = vcombine.high %v100_v37, %v100_v37  ;;  %v1366_v41 = vld [vmem:[#allocation5 + $0x178] sm:$0xff]  }
  0x47   :  { %1168 = vmatprep.subr.bf16.mxu0 %v1346_v12  ;;  %v1361_v32 = vld [vmem:[#allocation5 + $0x88] sm:$0xff]   ;;  %v1365_v39 = vld [vmem:[#allocation5 + $0x80] sm:$0xff]   ;;  %v1368_v48 = vld [vmem:[#allocation5 + $0x138] sm:$0xff]  }
  0x48   :  { %1189 = vmatpush3.bf16.msra.mxu1 %v1345_v11  ;;  %v119_v42 = vcombine.high %v111_v38, %v111_v38  ;;  %v118_v43 = vrot.slane %v104_v40, %v110_v34  ;;  %v144_v44 = vpack.c.bf16 %v111_v38, %v111_v38  ;;  %v1369_v50 = vld [vmem:[#allocation5 + $0x170] sm:$0xff]   ;;  %v1371_v53 = vld [vmem:[#allocation5 + $0x168] sm:$0xff]   ;;  %v1373_v55 = vld [vmem:[#allocation5 + $0x160] sm:$0xff]  }
  0x49   :  { %1190 = vmatprep.subr.bf16.mxu1 %v1348_v14  ;;  %v1370_v52 = vld [vmem:[#allocation5 + $0x130] sm:$0xff]   ;;  %v1372_v54 = vld [vmem:[#allocation5 + $0x128] sm:$0xff]   ;;  %v1374_v56 = vld [vmem:[#allocation5 + $0x120] sm:$0xff]  }
  0x4a   :  { %1169 = vmatpush3.bf16.msra.mxu0 %v1347_v13  ;;  %v145_v46 = vpack.c.bf16 %v119_v42, %v119_v42  ;;  %v120_v47 = vcombine.high %v118_v43, %v118_v43  ;;  %v146_v49 = vpack.c.bf16 %v118_v43, %v118_v43  ;;  %v1375_v57 = vld [vmem:[#allocation5 + $0x158] sm:$0xff]   ;;  %v1383_v58 = vld [vmem:[#allocation5 + $0x180] sm:$0xff]   ;;  %v1377_v63 = vld [vmem:[#allocation5 + $0x150] sm:$0xff]  }
  0x4b   :  { %1170 = vmatprep.subr.bf16.mxu0 %v1350_v16  ;;  %v101_v59 = vld [vmem:[#allocation2 + $0x8] sm:$0x3f]  ;;  %v1378_v2 = vld [vmem:[#allocation5 + $0x110] sm:$0xff]   ;;  %v1379_v5 = vld [vmem:[#allocation5 + $0x148] sm:$0xff]  }
  0x4c   :  { %1191 = vmatpush3.bf16.msra.mxu1 %v1349_v15  ;;  %586 = vmatprep.mubr.bf16.mxu0 %v145_v46  ;;  %v147_v51 = vpack.c.bf16 %v120_v47, %v120_v47  ;;  %v1376_v60 = vld [vmem:[#allocation5 + $0x118] sm:$0xff]   ;;  %v121_v61 = vcombine.high %v101_v59, %v101_v59  ;;  %v128_v62 = vrot.slane %v101_v59, %v110_v34  ;;  %v1380_v6 = vld [vmem:[#allocation5 + $0x108] sm:$0xff]   ;;  %v1381_v7 = vld [vmem:[#allocation5 + $0x140] sm:$0xff]  }
  0x4d   :  { %1192 = vmatprep.subr.bf16.mxu1 %v1352_v18  ;;  %v1382_v8 = vld [vmem:[#allocation5 + $0x100] sm:$0xff]   ;;  %v1386_v11 = vld [vmem:[#allocation7 + $0x30] sm:$0xff]   ;;  %v1387_v12 = vld [vmem:[#allocation7 + $0x28] sm:$0xff]  }
  0x4e   :  { %1171 = vmatpush3.bf16.msra.mxu0 %v1351_v17  ;;  %626 = vmatprep.mubr.bf16.mxu1 %v147_v51  ;;  %v135_v0 = vrot.slane %v121_v61, %v110_v34  ;;  %v136_v1 = vcombine.high %v128_v62, %v128_v62  ;;  %v148_v9 = vpack.c.bf16 %v128_v62, %v128_v62  ;;  %v1385_v10 = vld [vmem:[#allocation7 + $0x38] sm:$0xff]   ;;  %v1388_v13 = vld [vmem:[#allocation7 + $0x20] sm:$0xff]   ;;  %v1390_v15 = vld [vmem:[#allocation7 + $0x10] sm:$0xff]  }
  0x4f   :  { %1172 = vmatprep.subr.bf16.mxu0 %v1354_v20  ;;  %v1389_v14 = vld [vmem:[#allocation7 + $0x18] sm:$0xff]   ;;  %v1391_v16 = vld [vmem:[#allocation7 + $0x8] sm:$0xff]   ;;  %v1392_v17 = vld [vmem:[#allocation7] sm:$0xff]  }
  0x50   :  { %1193 = vmatpush3.bf16.msra.mxu1 %v1353_v19  ;;  %v149_v3 = vpack.c.bf16 %v136_v1, %v136_v1  ;;  %v150_v4 = vpack.c.bf16 %v135_v0, %v135_v0  ;;  %v1393_v18 = vld [vmem:[#allocation8 + $0x38] sm:$0xff]   ;;  %v1394_v19 = vld [vmem:[#allocation8 + $0x30] sm:$0xff]   ;;  %v1395_v20 = vld [vmem:[#allocation8 + $0x28] sm:$0xff]  }
  0x51   :  { %1194 = vmatprep.subr.bf16.mxu1 %v1356_v25  ;;  %v1396_v21 = vld [vmem:[#allocation8 + $0x20] sm:$0xff]   ;;  %v1397_v22 = vld [vmem:[#allocation8 + $0x18] sm:$0xff]   ;;  %v1398_v23 = vld [vmem:[#allocation8 + $0x10] sm:$0xff]  }
  0x52   :  { %1173 = vmatpush3.bf16.msra.mxu0 %v1355_v24  ;;  %v1084_v37 = vld [vmem:[%s1680_s2] ss:$0 sm:$0xff] }
  0x53   :  { %1174 = vmatprep.subr.bf16.mxu0 %v1358_v27  ;;  %v1399_v51 = vld [vmem:[#allocation8 + $0x8] sm:$0xff]  }
  0x54   :  { %1195 = vmatpush3.bf16.msra.mxu1 %v1357_v26  ;;  %v1135_v59 = vld [vmem:[%s1682_s4] ss:$0 sm:$0xff] }
  0x55   :  { %1196 = vmatprep.subr.bf16.mxu1 %v1360_v31 }
  0x56   :  { %1175 = vmatpush3.bf16.msra.mxu0 %v1359_v30 }
  0x57   :  { %1176 = vmatprep.subr.bf16.mxu0 %v1362_v33 }
  0x58   :  { %1197 = vmatpush3.bf16.msra.mxu1 %v1361_v32 }
  0x59   :  { %1198 = vmatprep.subr.bf16.mxu1 %v1364_v36 }
  0x5a   :  { %1177 = vmatpush3.bf16.msra.mxu0 %v1363_v35 }
  0x5b   :  { %1206 = vmatprep.subr.bf16.mxu0 %v1366_v41 }
  0x5c   :  { %1199 = vmatpush3.bf16.msra.mxu1 %v1365_v39 }
  0x5d   :  { %1257 = vmatprep.subr.bf16.mxu1 %v1549_v45  ;;  %587 = vmatmul.mubr.bf16.vlgmr.msra.gmra.mxu0 %v144_v44 }
  0x5e   :  { %1207 = vmatpush3.bf16.msra.mxu0 %v1368_v48  ;;  %666 = vmatprep.mubr.bf16.mxu0 %v149_v3  ;;  %v1407_v3 = vld [vmem:[#allocation10 + $0x8] sm:$0xff]  }
  0x5f   :  { %627 = vmatmul.mubr.bf16.vlgmr.msra.gmra.mxu1 %v146_v49  ;;  %1208 = vmatprep.subr.bf16.mxu0 %v1369_v50 }
  0x60   :  { %1259 = vmatprep.mubr.msk.bf16.mxu1 %vm1550_vm0, %v1549_v45  ;;  %1258 = vmatpush3.bf16.msra.mxu1 %v1383_v58  ;;  %v1406_v58 = vld [vmem:[#allocation10 + $0x10] sm:$0xff]  }
  0x61   :  { %1263 = vmatprep.subr.bf16.mxu1 %v1549_v45 }
  0x62   :  { %1209 = vmatpush3.bf16.msra.mxu0 %v1370_v52  ;;  %v1400_v52 = vld [vmem:[#allocation8] sm:$0xff]  }
  0x63   :  { %1210 = vmatprep.subr.bf16.mxu0 %v1371_v53  ;;  %v1401_v53 = vld [vmem:[#allocation10 + $0x38] sm:$0xff]  }
  0x66   :  { %1211 = vmatpush3.bf16.msra.mxu0 %v1372_v54  ;;  %v1402_v54 = vld [vmem:[#allocation10 + $0x30] sm:$0xff]  }
  0x67   :  { %1212 = vmatprep.subr.bf16.mxu0 %v1373_v55  ;;  %1260 = vmatmul.mubr.msk.bf16.vlgmr.msra.gmra.mxu1 %vm550_vm1, %v150_v4  ;;  %v1403_v55 = vld [vmem:[#allocation10 + $0x28] sm:$0xff]   ;;  %v1408_v4 = vld [vmem:[#allocation10] sm:$0xff]  }
  0x68   :  { %1279 = vmatprep.mubr.msk.bf16.mxu1 %vm1550_vm0, %v1549_v45  ;;  %1264 = vmatpush3.bf16.msra.mxu1 %v1385_v10 }
  0x69   :  { %1265 = vmatprep.subr.bf16.mxu1 %v1549_v45 }
  0x6a   :  { %1213 = vmatpush3.bf16.msra.mxu0 %v1374_v56  ;;  %v1404_v56 = vld [vmem:[#allocation10 + $0x20] sm:$0xff]  }
  0x6b   :  { %1214 = vmatprep.subr.bf16.mxu0 %v1375_v57  ;;  %v1405_v57 = vld [vmem:[#allocation10 + $0x18] sm:$0xff]  }
  0x6c   :  { %1266 = vmatpush3.bf16.msra.mxu1 %v1386_v11 }
  0x6d   :  { %1267 = vmatprep.subr.bf16.mxu1 %v1549_v45 }
  0x6e   :  { %1215 = vmatpush3.bf16.msra.mxu0 %v1376_v60 }
  0x6f   :  { %1216 = vmatprep.subr.bf16.mxu0 %v1377_v63 }
  0x70   :  { %1268 = vmatpush3.bf16.msra.mxu1 %v1387_v12 }
  0x71   :  { %1269 = vmatprep.subr.bf16.mxu1 %v1549_v45 }
  0x72   :  { %1217 = vmatpush3.bf16.msra.mxu0 %v1378_v2 }
  0x73   :  { %1218 = vmatprep.subr.bf16.mxu0 %v1379_v5  ;;  %v1144_v5 = vld [vmem:[%s1684_s6] ss:$0 sm:$0xff]  ;;  %s1551_s6 = smov [#allocation11]  }
  0x74   :  { %1270 = vmatpush3.bf16.msra.mxu1 %v1388_v13  ;;  %v1153_v13 = vld [vmem:[%s1686_s8] ss:$0 sm:$0xff]  ;;  %s1073_s8 = sshll.u32 %s1551_s6, 4  ;;  %s1074_s8 = int_to_ptr.vmem [resolvable:$true] %s1073_s8 }
  0x75   :  { %1271 = vmatprep.subr.bf16.mxu1 %v1549_v45  ;;  %s1513_s16 = scalar_lea.vmem %s1074_s8, 16  ;;  %s1517_s17 = scalar_lea.vmem %s1074_s8, 32 }
  0x76   :  { %1219 = vmatpush3.bf16.msra.mxu0 %v1380_v6  ;;  %p1514_p11 = scmp.ne.s32.totalorder %s1074_s8, %s1513_s16  ;;  %p1518_p12 = scmp.lt.s32.totalorder %s1074_s8, %s1074_s8 }
  0x77   :  { %1220 = vmatprep.subr.bf16.mxu0 %v1381_v7  ;;  %p1519_p13 = scmp.lt.s32.totalorder %s1517_s17, %s1513_s16 }
  0x78   :  { %1272 = vmatpush3.bf16.msra.mxu1 %v1389_v14 }
  0x79   :  { %1273 = vmatprep.subr.bf16.mxu1 %v1549_v45  ;;  %p1520_p0 = por %p1519_p13, %p1518_p12 }
  0x7a   :  { %1221 = vmatpush3.bf16.msra.mxu0 %v1382_v8 }
  0x7b   :  { %1283 = vmatprep.subr.bf16.mxu0 %v1549_v45  ;;  %p1521_p1 = pnand %p1520_p0, %p1514_p11 }
  0x7c   :  { %1274 = vmatpush3.bf16.msra.mxu1 %v1390_v15 }
  0x7d   :  { %667 = vmatmul.mubr.bf16.vlgmr.msra.gmra.mxu0 %v148_v9  ;;  %1275 = vmatprep.subr.bf16.mxu1 %v1549_v45 }
  0x7e   :  { %1299 = vmatprep.mubr.msk.bf16.mxu0 %vm1550_vm0, %v1549_v45  ;;  %1284 = vmatpush3.bf16.msra.mxu0 %v1393_v18 }
  0x7f   :  { %1285 = vmatprep.subr.bf16.mxu0 %v1549_v45 }
  0x80   :  { %1276 = vmatpush3.bf16.msra.mxu1 %v1391_v16 }
  0x81   :  { %1277 = vmatprep.subr.bf16.mxu1 %v1549_v45 }
  0x82   :  { %1286 = vmatpush3.bf16.msra.mxu0 %v1394_v19 }
  0x83   :  { %1287 = vmatprep.subr.bf16.mxu0 %v1549_v45 }
  0x84   :  { %1278 = vmatpush3.bf16.msra.mxu1 %v1392_v17 }
  0x85   :  { %1303 = vmatprep.subr.bf16.mxu1 %v1549_v45 }
  0x86   :  { %1288 = vmatpush3.bf16.msra.mxu0 %v1395_v20 }
  0x87   :  { %1289 = vmatprep.subr.bf16.mxu0 %v1549_v45 }
  0x8a   :  { %1290 = vmatpush3.bf16.msra.mxu0 %v1396_v21 }
  0x8b   :  { %1291 = vmatprep.subr.bf16.mxu0 %v1549_v45 }
  0x8e   :  { %1292 = vmatpush3.bf16.msra.mxu0 %v1397_v22 }
  0x8f   :  { %1293 = vmatprep.subr.bf16.mxu0 %v1549_v45 }
  0x92   :  { %1294 = vmatpush3.bf16.msra.mxu0 %v1398_v23 }
  0x93   :  { %1295 = vmatprep.subr.bf16.mxu0 %v1549_v45 }
  0x96   :  { %1296 = vmatpush3.bf16.msra.mxu0 %v1399_v51 }
  0x97   :  { %1297 = vmatprep.subr.bf16.mxu0 %v1549_v45 }
  0x9a   :  { %1298 = vmatpush3.bf16.msra.mxu0 %v1400_v52 }
 0x11d   :  { %v1178_v24 = vpop.f32.mrf.mxu0 }
 0x11f   :  { %v1179_v25 = vpop.f32.mrf.mxu0  ;;  %v1200_v26 = vpop.f32.mrf.mxu1 }
 0x120   :  { %v1180_v36 = vadd.f32 %v1179_v25, %v1178_v24 }
 0x121   :  { %v1181_v27 = vpop.f32.mrf.mxu0  ;;  %v1201_v28 = vpop.f32.mrf.mxu1 }
 0x122   :  { %v589_v38 = vadd.f32 %v1180_v36, %v1084_v37  ;;  %v1202_v39 = vadd.f32 %v1201_v28, %v1200_v26 }
 0x123   :  { %v1182_v29 = vpop.f32.mrf.mxu0  ;;  %v1203_v30 = vpop.f32.mrf.mxu1 }
 0x124   :  { %v629_v42 = vadd.f32 %v1202_v39, %v589_v38 }
 0x125   :  { %v1204_v31 = vpop.f32.mrf.mxu1 }
 0x127   :  { %v708_v32 = vpop.f32.mrf.mxu1 }
 0x129   :  { %v1261_v33 = vpop.f32.mrf.mxu1 }
 0x12b   :  { %v711_v34 = vpop.f32.mrf.mxu1 }
 0x12d   :  { %v1262_v35 = vpop.f32.mrf.mxu1 }
 0x13d   :  { %v1222_v40 = vpop.f32.mrf.mxu0 }
 0x13f   :  { %v1223_v41 = vpop.f32.mrf.mxu0 }
 0x140   :  { %v1224_v43 = vadd.f32 %v1223_v41, %v1222_v40 }
 0x141   :  { %v1225_v44 = vpop.f32.mrf.mxu0 }
 0x142   :  { %v669_v46 = vadd.f32 %v1224_v43, %v629_v42 }
 0x143   :  { %v1226_v47 = vpop.f32.mrf.mxu0 }
 0x144   :  { %v709_v48 = vadd.f32 %v708_v32, %v669_v46 }
 0x146   :  { %v714_v49 = vmax.f32 %v709_v48, 0.0 }
 0x148   :  { %v715_v50 = vpack.c.bf16 %v714_v49, %v714_v49 }
 0x14a   :  { %1280 = vmatmul.mubr.bf16.vlgmr.msra.gmra.mxu1 %v715_v50 }
 0x14b   :  { %1319 = vmatprep.mubr.msk.bf16.mxu1 %vm1550_vm0, %v1549_v45  ;;  %1304 = vmatpush3.bf16.msra.mxu1 %v1401_v53 }
 0x14c   :  { %1305 = vmatprep.subr.bf16.mxu1 %v1549_v45 }
 0x14f   :  { %1306 = vmatpush3.bf16.msra.mxu1 %v1402_v54 }
 0x150   :  { %1307 = vmatprep.subr.bf16.mxu1 %v1549_v45 }
 0x153   :  { %1308 = vmatpush3.bf16.msra.mxu1 %v1403_v55 }
 0x154   :  { %1309 = vmatprep.subr.bf16.mxu1 %v1549_v45 }
 0x157   :  { %1310 = vmatpush3.bf16.msra.mxu1 %v1404_v56 }
 0x158   :  { %1311 = vmatprep.subr.bf16.mxu1 %v1549_v45 }
 0x15b   :  { %1312 = vmatpush3.bf16.msra.mxu1 %v1405_v57 }
 0x15c   :  { %1313 = vmatprep.subr.bf16.mxu1 %v1549_v45 }
 0x15f   :  { %1314 = vmatpush3.bf16.msra.mxu1 %v1406_v58 }
 0x160   :  { %1315 = vmatprep.subr.bf16.mxu1 %v1549_v45 }
 0x163   :  { %1316 = vmatpush3.bf16.msra.mxu1 %v1407_v3 }
 0x164   :  { %1317 = vmatprep.subr.bf16.mxu1 %v1549_v45 }
 0x167   :  { %1318 = vmatpush3.bf16.msra.mxu1 %v1408_v4 }
 0x20a   :  { %v821_v60 = vpop.f32.mrf.mxu1 }
 0x20b   :  { %v822_v61 = vadd.f32 %v1135_v59, %v821_v60 }
 0x20c   :  { %v1281_v62 = vpop.f32.mrf.mxu1 }
 0x20d   :  { %v827_v63 = vmax.f32 %v822_v61, 0.0 }
 0x20e   :  { %v824_v0 = vpop.f32.mrf.mxu1 }
 0x20f   :  { %v828_v1 = vpack.c.bf16 %v827_v63, %v827_v63 }
 0x210   :  { %v1282_v2 = vpop.f32.mrf.mxu1 }
 0x211   :  { %1300 = vmatmul.mubr.bf16.vlgmr.msra.gmra.mxu0 %v828_v1 }
 0x2d1   :  { %v934_v6 = vpop.f32.mrf.mxu0 }
 0x2d2   :  { %v935_v7 = vadd.f32 %v1144_v5, %v934_v6 }
 0x2d3   :  { %v1301_v8 = vpop.f32.mrf.mxu0 }
 0x2d4   :  { %v940_v9 = vmax.f32 %v935_v7, 0.0 }
 0x2d5   :  { %v937_v10 = vpop.f32.mrf.mxu0 }
 0x2d6   :  { %v941_v11 = vpack.c.bf16 %v940_v9, %v940_v9 }
 0x2d7   :  { %v1302_v12 = vpop.f32.mrf.mxu0 }
 0x2d8   :  { %1320 = vmatmul.mubr.bf16.vlgmr.msra.gmra.mxu1 %v941_v11 }
 0x398   :  { %v1047_v14 = vpop.f32.mrf.mxu1 }
 0x399   :  { %v1048_v45 = vadd.f32 %v1153_v13, %v1047_v14 }
 0x39a   :  { %v1321_v15 = vpop.f32.mrf.mxu1 }
 0x39b   :  { %v1054_v16 = vsel %vm1053_vm2, %v1048_v45, -inf }
 0x39c   :  { %1055 = vmax.xlane.f32.xlu0 %v1054_v16  ;;  %v1050_v17 = vpop.f32.mrf.mxu1 }
 0x39e   :  { %v1322_v18 = vpop.f32.mrf.mxu1 }
 0x425   :  { %v1056_v19 = vpop.xlane.xlu0 %1055 }
 0x426   :  { %v1057_v20 = vsub.f32 %v1048_v45, %v1056_v19 }
 0x428   :  { %v1058_v21 = vmul.f32 1.442695, %v1057_v20 }
 0x42a   :  { %1409 = vpow2.f32 %v1058_v21 }
 0x437   :  { %v1410_v22 = vpop.eup %1409 }
 0x438   :  { %v1060_v23 = vsel %vm1053_vm2, %v1410_v22, 0.0 }
 0x439   :  { %1061 = vadd.xlane.f32.xlu0 %v1060_v23 }
 0x4c2   :  { %v1062_v24 = vpop.xlane.xlu0 %1061 }
 0x4c3   :  { %1411 = vrcp.f32 %v1062_v24 }
 0x4d0   :  { %v1412_v25 = vpop.eup %1411 }
 0x4d1   :  { %v1064_v26 = vmul.f32 %v1412_v25, %v1410_v22 }
 0x4d3   :  { %v1065_v27 = vpack.c.bf16 %v1064_v26, %v1064_v26 }
 0x4d5   :  { %1066 = vst [vmem:[#allocation11] sm:$0x1] %v1065_v27 }
 0x4d6   :  { %1524 = shalt.err (!%p1521_p1)
}
 0x4d7   :  { %1076 = dma.vmem_to_hbm [thread:$0]  %s1074_s8, 16, %s1687_s9, [#allocation4]  }
 0x4d8   :  { %1539 = dma.done.wait [#allocation4], 16  }
 0x4d9   :  { %1540 = vsyncadd [#allocation4], 4294967280 }
 0x4da   :  { %1080 = vsyncpa [#allocation3], 1 }
 0x4db   :  { %1081 = vsyncpa [#allocation6], 1 }
 0x4dc   :  { %1082 = vsyncpa [#allocation9], 1 }
 0x4dd   :  { %1083 = vsyncpa [#allocation4], 1 }

</bundles_post_ra>
